<compile_context>
chip_gen: v7x
topology: tpu7x:2x2x1
jax: 0.10.0
libtpu: 0.0.40
codegen_flags: <defaults>
</compile_context>

<pallas_src>
import math
import jax
import jax.numpy as jnp
from jax.experimental import pallas as pl
from jax.experimental.pallas import tpu as pltpu


def attention_kernel(x_ref, w_ref, b_ref, o_ref):
    # x_ref : (TB, S, F)  batch tile (input dtype)
    # w_ref : (1, F)      attention projection weight (f32 row view of (F, 1))
    # b_ref : (1, S)      per-step bias (f32)
    # o_ref : (TB, F)     weighted-sum output (input dtype)
    x = x_ref[...]                                     # (TB, S, F)
    w = w_ref[...]                                     # (1, F)
    b = b_ref[...]                                     # (1, S)

    xf = x.astype(jnp.float32)

    # eij[b, s] = sum_f x[b, s, f] * w[f]   (lane reduction; f32 accumulation)
    eij = jnp.sum(xf * w, axis=-1) + b                 # (TB, S) f32
    eij = jax.nn.sigmoid(eij)
    a = jnp.exp(eij)                                   # (TB, S) f32

    denom = jnp.sum(a, axis=-1, keepdims=True) + 1e-10     # (TB, 1)
    a = a * pl.reciprocal(denom, approx=False)              # exact reciprocal

    # Weighted sum over the step axis -> (TB, F), f32 accumulation.
    o = jnp.sum(xf * a[:, :, None], axis=1)
    o_ref[...] = o.astype(o_ref.dtype)


def _vmem_budgets():
    """Return (working_set_budget_bytes, vmem_limit_bytes) per TPU generation."""
    try:
        cap = pltpu.get_tpu_info().vmem_capacity_bytes
    except Exception:
        cap = 64 * 1024 * 1024  # conservative: assume a 64-MiB-VMEM part (v7x)
    if cap >= 100 * 1024 * 1024:
        # v5e / v6e: 128 MiB physical VMEM -> bigger tiles, fewer grid steps.
        return 48 * 1024 * 1024, 64 * 1024 * 1024
    # v7x: 64 MiB physical VMEM -> keep total per-step footprint well under 48 MiB.
    return 32 * 1024 * 1024, 48 * 1024 * 1024


def _choose_batch_tile(B, S, F, itemsize, budget_bytes):
    """Pick TB from the true tiled VMEM footprint of one batch row."""
    sub = {4: 8, 2: 16, 1: 32}.get(itemsize, 8)     # sublane packing granularity
    Fpad = -(-F // 128) * 128
    Spad_in = -(-S // sub) * sub
    Spad_32 = -(-S // 8) * 8

    x_row = Spad_in * Fpad * itemsize                # one x tile buffer, per row
    tmp_row = 2 * Spad_32 * Fpad * 4                 # two f32 (S, F) temporaries
    out_row = 2 * Fpad * 4                           # double-buffered output row
    a_row = 2 * (-(-S // 128) * 128) * 4             # eij / a rows
    per_row = 2 * x_row + tmp_row + out_row + a_row  # 2x: double-buffered x input

    tb = max(1, budget_bytes // per_row)
    if tb >= B:
        tb = B

    # Keep >= 2 grid steps when B allows it, so v7x's second TensorCore gets work.
    half = ((-(-B // 2)) // sub) * sub
    if half >= sub:
        tb = min(tb, half)

    if tb >= B:
        return B
    # Sublane-granular tile for dense output stores.
    return max(sub, (tb // sub) * sub)


def attention_forward(x, weight, bias):
    """x: (B, S, F), weight: (F, 1), bias: (S,) -> (B, F)"""
    B, S, F = x.shape
    w_row = weight.reshape(1, F).astype(jnp.float32)
    b_row = bias.reshape(1, S).astype(jnp.float32)

    itemsize = jnp.dtype(x.dtype).itemsize
    budget_bytes, vmem_limit = _vmem_budgets()
    TB = _choose_batch_tile(B, S, F, itemsize, budget_bytes)
    grid = (pl.cdiv(B, TB),)

    return pl.pallas_call(
        attention_kernel,
        out_shape=jax.ShapeDtypeStruct((B, F), x.dtype),
        grid_spec=pltpu.PrefetchScalarGridSpec(
            num_scalar_prefetch=0,
            grid=grid,
            in_specs=[
                pl.BlockSpec((TB, S, F), lambda i: (i, 0, 0)),   # x: one batch tile
                pl.BlockSpec((1, F), lambda i: (0, 0)),          # weight (replicated)
                pl.BlockSpec((1, S), lambda i: (0, 0)),          # bias (replicated)
            ],
            out_specs=pl.BlockSpec((TB, F), lambda i: (i, 0)),
        ),
        compiler_params=pltpu.CompilerParams(
            dimension_semantics=("parallel",),
            vmem_limit_bytes=vmem_limit,
        ),
    )(x, w_row, b_row)


def reference_forward(x, weight, bias):
    B, S, F = x.shape
    xf = x.astype(jnp.float32)
    eij = (xf.reshape(-1, F) @ weight.astype(jnp.float32)).reshape(B, S) + bias[None, :]
    eij = jax.nn.sigmoid(eij)
    a = jnp.exp(eij)
    a = a / (jnp.sum(a, axis=1, keepdims=True) + 1e-10)
    return jnp.sum(xf * a[..., None], axis=1).astype(x.dtype)


if __name__ == "__main__":
    key = jax.random.PRNGKey(0)
    kx, kw, kx2 = jax.random.split(key, 3)

    # Parameter init mirroring the PyTorch module:
    #   weight = kaiming_uniform_(zeros(feature_dim, 1)) -> U(-bound, bound)
    #   (fan_in = 1 for a (F, 1) tensor, gain = sqrt(2), bound = gain*sqrt(3/fan_in))
    bound = math.sqrt(2.0) * math.sqrt(3.0 / 1.0)

    # Case 1: small shapes consistent with the module (batch=2, step=8, feature=32).
    B, S, F = 2, 8, 32
    x = jax.random.normal(kx, (B, S, F), dtype=jnp.float32)
    weight = jax.random.uniform(kw, (F, 1), dtype=jnp.float32,
                                minval=-bound, maxval=bound)
    bias = jnp.zeros((S,), dtype=jnp.float32)

    out = attention_forward(x, weight, bias)
    jax.block_until_ready(out)
    ref = reference_forward(x, weight, bias)
    assert out.shape == (B, F)
    assert jnp.allclose(out, ref, atol=1e-5, rtol=1e-5)

    # Case 2: B not a multiple of the batch tile -> exercises the pad-free
    # masked-edge-block path and the multi-step (>= 2) parallel grid.
    B2, S2, F2 = 20, 8, 128
    x2 = jax.random.normal(kx2, (B2, S2, F2), dtype=jnp.float32)
    w2 = jax.random.uniform(kw, (F2, 1), dtype=jnp.float32,
                            minval=-bound, maxval=bound)
    b2 = jnp.zeros((S2,), dtype=jnp.float32)

    out2 = attention_forward(x2, w2, b2)
    jax.block_until_ready(out2)
    ref2 = reference_forward(x2, w2, b2)
    assert out2.shape == (B2, F2)
    assert jnp.allclose(out2, ref2, atol=1e-5, rtol=1e-5)

    print("KERNEL_OK")
</pallas_src>

<mosaic_0001>
module attributes {stable_mosaic.version = 11 : i64} {
  func.func @attention_kernel(%arg0: i32, %arg1: memref<2x8x32xf32, #tpu.memory_space<vmem>>, %arg2: memref<1x32xf32, #tpu.memory_space<vmem>>, %arg3: memref<1x8xf32, #tpu.memory_space<vmem>>, %arg4: memref<2x32xf32, #tpu.memory_space<vmem>>) attributes {dimension_semantics = [#tpu.dimension_semantics<parallel>], iteration_bounds = array<i64: 1>, scalar_prefetch = 0 : i64, scratch_operands = 0 : i64, tpu.core_type = #tpu.core_type<tc>, window_params = [{transform_indices = @transform_0, window_bounds = array<i64: 2, 8, 32>}, {pipeline_mode = #tpu.pipeline_mode<synchronous>, transform_indices = @transform_1, window_bounds = array<i64: 1, 32>}, {pipeline_mode = #tpu.pipeline_mode<synchronous>, transform_indices = @transform_2, window_bounds = array<i64: 1, 8>}, {transform_indices = @transform_3, window_bounds = array<i64: 2, 32>}]} {
    %c0 = arith.constant 0 : index
    %c0_0 = arith.constant 0 : index
    %c0_1 = arith.constant 0 : index
    %0 = vector.load %arg1[%c0, %c0_0, %c0_1] : memref<2x8x32xf32, #tpu.memory_space<vmem>>, vector<2x8x32xf32>
    %c0_2 = arith.constant 0 : index
    %c0_3 = arith.constant 0 : index
    %1 = vector.load %arg2[%c0_2, %c0_3] : memref<1x32xf32, #tpu.memory_space<vmem>>, vector<1x32xf32>
    %c0_4 = arith.constant 0 : index
    %c0_5 = arith.constant 0 : index
    %2 = vector.load %arg3[%c0_4, %c0_5] : memref<1x8xf32, #tpu.memory_space<vmem>>, vector<1x8xf32>
    %3 = vector.shape_cast %1 : vector<1x32xf32> to vector<1x1x32xf32>
    %4 = vector.broadcast %3 : vector<1x1x32xf32> to vector<2x8x32xf32>
    %5 = arith.mulf %0, %4 : vector<2x8x32xf32>
    %cst = arith.constant dense<0.000000e+00> : vector<2x8xf32>
    %6 = vector.multi_reduction <add>, %5, %cst [2] : vector<2x8x32xf32> to vector<2x8xf32>
    %7 = vector.broadcast %2 : vector<1x8xf32> to vector<2x8xf32>
    %8 = arith.addf %6, %7 : vector<2x8xf32>
    %9 = arith.negf %8 : vector<2x8xf32>
    %10 = math.exp %9 : vector<2x8xf32>
    %cst_6 = arith.constant 1.000000e+00 : f32
    %11 = vector.broadcast %cst_6 : f32 to vector<2x8xf32>
    %12 = arith.addf %11, %10 : vector<2x8xf32>
    %13 = arith.divf %11, %12 : vector<2x8xf32>
    %14 = math.exp %13 : vector<2x8xf32>
    %cst_7 = arith.constant dense<0.000000e+00> : vector<2xf32>
    %15 = vector.multi_reduction <add>, %14, %cst_7 [1] : vector<2x8xf32> to vector<2xf32>
    %16 = vector.shape_cast %15 : vector<2xf32> to vector<2x1xf32>
    %cst_8 = arith.constant 1.000000e-10 : f32
    %17 = vector.broadcast %cst_8 : f32 to vector<2x1xf32>
    %18 = arith.addf %16, %17 : vector<2x1xf32>
    %19 = tpu.reciprocal %18 : vector<2x1xf32> -> vector<2x1xf32>
    %20 = vector.broadcast %19 : vector<2x1xf32> to vector<2x8xf32>
    %21 = arith.mulf %14, %20 : vector<2x8xf32>
    %22 = vector.shape_cast %21 : vector<2x8xf32> to vector<2x8x1xf32>
    %23 = vector.broadcast %22 : vector<2x8x1xf32> to vector<2x8x32xf32>
    %24 = arith.mulf %0, %23 : vector<2x8x32xf32>
    %cst_9 = arith.constant dense<0.000000e+00> : vector<2x32xf32>
    %25 = vector.multi_reduction <add>, %24, %cst_9 [1] : vector<2x8x32xf32> to vector<2x32xf32>
    %c0_10 = arith.constant 0 : index
    %c0_11 = arith.constant 0 : index
    %26 = vector.load %arg4[%c0_10, %c0_11] : memref<2x32xf32, #tpu.memory_space<vmem>>, vector<2x32xf32>
    tpu.vector_store %arg4[%c0_10, %c0_11], %25 {strides = array<i32>} : memref<2x32xf32, #tpu.memory_space<vmem>>, vector<2x32xf32>,
    return
  }
  func.func @transform_0(%arg0: i32) -> (i32, i32, i32) {
    %c0_i32 = arith.constant 0 : i32
    %c0_i32_0 = arith.constant 0 : i32
    %c0_i32_1 = arith.constant 0 : i32
    return %arg0, %c0_i32, %c0_i32_0 : i32, i32, i32
  }
  func.func @transform_1(%arg0: i32) -> (i32, i32) {
    %c0_i32 = arith.constant 0 : i32
    %c0_i32_0 = arith.constant 0 : i32
    %c0_i32_1 = arith.constant 0 : i32
    return %c0_i32, %c0_i32_0 : i32, i32
  }
  func.func @transform_2(%arg0: i32) -> (i32, i32) {
    %c0_i32 = arith.constant 0 : i32
    %c0_i32_0 = arith.constant 0 : i32
    %c0_i32_1 = arith.constant 0 : i32
    return %c0_i32, %c0_i32_0 : i32, i32
  }
  func.func @transform_3(%arg0: i32) -> (i32, i32) {
    %c0_i32 = arith.constant 0 : i32
    %c0_i32_0 = arith.constant 0 : i32
    return %arg0, %c0_i32 : i32, i32
  }
}

</mosaic_0001>

<bundles_post_ra>
// kernel: tpu_custom_call.1
= control target key start
LH: loop header
LB: loop body
LE: loop exit
PB: predicated region body
PF: predicated region fallthrough
CT: control target
= control target key end

     0   :  { %8 = vsyncpa [#allocation3], 0  ;;  %s304_s0 = inlined_call_operand.hbm [shape: f32[2,8,32], index: 0, kind: input, shape index: {}]   ;;  %s305_s1 = inlined_call_operand.vmem [shape: f32[1,32], index: 1, kind: input, shape index: {}]   ;;  %s306_s2 = inlined_call_operand.vmem [shape: f32[1,8], index: 2, kind: input, shape index: {}]   ;;  %s307_s3 = inlined_call_operand.hbm [shape: f32[2,32], index: 3, kind: output, shape index: {}]  }
   0x1   :  { %9 = vsyncpa [#allocation4], 0  ;;  %s235_s12 = smov [#allocation2]   ;;  %s187_s16 = scalar_lea.hbm %s304_s0, 256 }
   0x2   :  { %s15_s13 = sshll.u32 %s235_s12, 4  ;;  %p188_p0 = scmp.ne.s32.totalorder %s304_s0, %s187_s16  ;;  %s16_s13 = int_to_ptr.vmem [resolvable:$true] %s15_s13 }
   0x3   :  { %p191_p1 = scmp.lt.u32.totalorder %s187_s16, %s304_s0 }
   0x5   :  { %p193_p2 = pnand %p191_p1, %p188_p0 }
   0x7   :  { %196 = shalt.err (!%p193_p2)
}
   0x8   :  { %s197_s21 = scalar_lea.vmem %s16_s13, 256  ;;  %p202_p4 = scmp.lt.s32.totalorder %s16_s13, %s16_s13 }
   0x9   :  { %p198_p3 = scmp.ne.s32.totalorder %s16_s13, %s197_s21  ;;  %p203_p5 = scmp.lt.s32.totalorder %s197_s21, %s197_s21 }
   0xb   :  { %p204_p6 = por %p203_p5, %p202_p4 }
   0xd   :  { %p205_p7 = pnand %p204_p6, %p198_p3 }
   0xf   :  { %208 = shalt.err (!%p205_p7)
}
  0x10   :  { %s236_s22 = smov 128   ;;  %s237_s23 = smov 8  }
  0x11   :  { %21 = dma.hbm_to_vmem [thread:$0]  %s304_s0, 256, %s16_s13, [#allocation3], %s236_s22, %s236_s22, %s237_s23  }
  0x12   :  { %231 = dma.done.wait [#allocation3], 256  }
  0x13   :  { %232 = vsyncadd [#allocation3], 4294967040  ;;  %v272_v0 = vld [vmem:[#allocation2] sm:$0xff]  ;;  %vm41_vm0 = vcmask 261120   ;;  %v277_v2 = vld [vmem:[#allocation2 + $0x8] sm:$0xff]  ;;  %v238_v8 = vmov 0   ;;  %v83_v26 = vlaneseq }
  0x14   :  { %v162_v1 = vld [vmem:[%s305_s1] ss:$0 sm:$0xff]  ;;  %171 = vset.pattern.permute.xlu1 %v238_v8  ;;  %172 = vset.pattern.permute.xlu0 %v238_v8  ;;  %vm93_vm1 = vcmask 1041409   ;;  %vm96_vm2 = vcmask 58368   ;;  %s239_s0 = smov [#allocation5]   ;;  %vm145_vm3 = vcmask 254976  }
  0x15   :  { %v39_v3 = vmul.f32 %v162_v1, %v272_v0  ;;  %v40_v4 = vmul.f32 %v162_v1, %v277_v2  ;;  %v163_v5 = vld [vmem:[%s306_s2] ss:$0 sm:$0xff]  ;;  %v84_v27 = vand.u32 127, %v83_v26  ;;  %v86_v28 = vshrl.u32 %v83_v26, 7  ;;  %s153_s1 = sshll.u32 %s239_s0, 4  ;;  %s154_s1 = int_to_ptr.vmem [resolvable:$true] %s153_s1 }
  0x16   :  { %54 = vbcast.lane.b32.xlu1 %v163_v5, 256  ;;  %s209_s2 = scalar_lea.vmem %s154_s1, 32  ;;  %p214_p9 = scmp.lt.s32.totalorder %s154_s1, %s154_s1 }
  0x17   :  { %v42_v6 = vsel %vm41_vm0, %v39_v3, 0.0  ;;  %v45_v7 = vsel %vm41_vm0, %v40_v4, 0.0  ;;  %v87_v29 = vsub.s32 %v84_v27, %v86_v28  ;;  %v109_v38 = vsub.s32 1, %v86_v28  ;;  %p210_p8 = scmp.ne.s32.totalorder %s154_s1, %s209_s2  ;;  %p215_p10 = scmp.lt.s32.totalorder %s209_s2, %s209_s2 }
  0x18   :  { %43 = vadd.xlane.f32.xlu0 %v42_v6  ;;  %v105_v39 = vsub.s32 0, %v86_v28 }
  0x19   :  { %p216_p11 = por %p215_p10, %p214_p9 }
  0x1b   :  { %p217_p12 = pnand %p216_p11, %p210_p8 }
  0x1c   :  { %46 = vadd.xlane.f32.xlu0 %v45_v7 }
  0x88   :  { %v55_v9 = vpop.permute.xlu1 %54 }
  0xa5   :  { %v44_v10 = vpop.xlane.xlu0 %43 }
  0xa6   :  { %v57_v11 = vadd.f32 %v55_v9, %v44_v10 }
  0xa8   :  { %v164_v12 = vmul.f32 -1.442695, %v57_v11 }
  0xa9   :  { %v47_v13 = vpop.xlane.xlu0 %46 }
  0xaa   :  { %173 = vpow2.f32 %v164_v12  ;;  %v58_v14 = vadd.f32 %v55_v9, %v47_v13 }
  0xac   :  { %v165_v15 = vmul.f32 -1.442695, %v58_v14 }
  0xae   :  { %175 = vpow2.f32 %v165_v15 }
  0xb4   :  { %v174_v16 = vpop.eup %173 }
  0xb5   :  { %v65_v17 = vadd.f32 1.0, %v174_v16 }
  0xb7   :  { %177 = vrcp.f32 %v65_v17 }
  0xb8   :  { %v176_v18 = vpop.eup %175 }
  0xb9   :  { %v66_v19 = vadd.f32 1.0, %v176_v18 }
  0xbb   :  { %179 = vrcp.f32 %v66_v19 }
  0xc1   :  { %v178_v20 = vpop.eup %177 }
  0xc2   :  { %v71_v21 = vmul.f32 1.442695, %v178_v20 }
  0xc4   :  { %181 = vpow2.f32 %v71_v21 }
  0xc5   :  { %v180_v22 = vpop.eup %179 }
  0xc6   :  { %v73_v23 = vmul.f32 1.442695, %v180_v22 }
  0xc8   :  { %183 = vpow2.f32 %v73_v23 }
  0xce   :  { %v182_v24 = vpop.eup %181 }
  0xcf   :  { %78 = vperm.xlu1 %171, %v182_v24  }
  0xd2   :  { %v184_v25 = vpop.eup %183 }
  0xd3   :  { %81 = vperm.xlu0 %172, %v184_v25  }
 0x14e   :  { %v79_v30 = vpop.permute.xlu1 %78 }
 0x14f   :  { %v88_v32 = vrot.slane %v79_v30, %v87_v29 }
 0x152   :  { %v82_v31 = vpop.permute.xlu0 %81 }
 0x153   :  { %v92_v33 = vrot.slane %v82_v31, %v87_v29 }
 0x155   :  { %v94_v34 = vsel %vm93_vm1, %v92_v33, %v88_v32 }
 0x156   :  { %v97_v35 = vsel %vm96_vm2, %v94_v34, 0.0 }
 0x157   :  { %98 = vadd.xlane.f32.xlu1 %v97_v35 }
 0x1e4   :  { %v99_v36 = vpop.xlane.xlu1 %98 }
 0x1e5   :  { %v100_v37 = vadd.f32 1e-10, %v99_v36 }
 0x1e7   :  { %185 = vrcp.f32 %v100_v37 }
 0x1f1   :  { %v186_v40 = vpop.eup %185 }
 0x1f2   :  { %v110_v41 = vrot.slane %v186_v40, %v109_v38  ;;  %v106_v42 = vrot.slane %v186_v40, %v105_v39 }
 0x1f4   :  { %v114_v43 = vmul.f32 %v184_v25, %v110_v41  ;;  %v113_v44 = vmul.f32 %v182_v24, %v106_v42 }
 0x1f6   :  { %122 = vperm.xlu0 %172, %v114_v43   ;;  %117 = vperm.xlu1 %171, %v113_v44  }
 0x275   :  { %v123_v45 = vpop.permute.xlu0 %122  ;;  %v118_v46 = vpop.permute.xlu1 %117 }
 0x276   :  { %v126_v47 = vmul.f32 %v123_v45, %v277_v2  ;;  %v125_v48 = vmul.f32 %v118_v46, %v272_v0 }
 0x278   :  { %v134_v49 = vsel %vm41_vm0, %v126_v47, 0.0  ;;  %v127_v50 = vsel %vm41_vm0, %v125_v48, 0.0 }
 0x279   :  { %v135_v51 = vrot.slane %v134_v49, 4  ;;  %v128_v52 = vrot.slane %v127_v50, 4 }
 0x27b   :  { %v136_v53 = vadd.f32 %v135_v51, %v134_v49  ;;  %v129_v54 = vadd.f32 %v128_v52, %v127_v50 }
 0x27d   :  { %v137_v55 = vrot.slane %v136_v53, 2  ;;  %v130_v56 = vrot.slane %v129_v54, 2 }
 0x27f   :  { %v138_v57 = vadd.f32 %v137_v55, %v136_v53  ;;  %v131_v58 = vadd.f32 %v130_v56, %v129_v54 }
 0x281   :  { %v139_v59 = vrot.slane %v138_v57, 1  ;;  %v132_v60 = vrot.slane %v131_v58, 1 }
 0x283   :  { %v140_v61 = vadd.f32 %v139_v59, %v138_v57  ;;  %v133_v62 = vadd.f32 %v132_v60, %v131_v58 }
 0x285   :  { %v143_v63 = vsel %vm93_vm1, %v140_v61, %v133_v62 }
 0x286   :  { %146 = vst.msk [vmem:[#allocation5] sm:$0x3] %vm145_vm3, %v143_v63 }
 0x287   :  { %220 = shalt.err (!%p217_p12)
}
 0x288   :  { %s221_s5 = scalar_lea.hbm %s307_s3, 32 }
 0x289   :  { %p222_p13 = scmp.ne.s32.totalorder %s307_s3, %s221_s5  ;;  %p225_p0 = scmp.lt.u32.totalorder %s221_s5, %s307_s3 }
 0x28b   :  { %p227_p1 = pnand %p225_p0, %p222_p13 }
 0x28d   :  { %230 = shalt.err (!%p227_p1)
}
 0x28e   :  { %156 = dma.vmem_to_hbm [thread:$0]  %s154_s1, 32, %s307_s3, [#allocation4]  }
 0x28f   :  { %233 = dma.done.wait [#allocation4], 32  }
 0x290   :  { %234 = vsyncadd [#allocation4], 4294967264 }
 0x291   :  { %160 = vsyncpa [#allocation3], 1 }
 0x292   :  { %161 = vsyncpa [#allocation4], 1 }

</bundles_post_ra>
